<compile_context>
chip_gen: v7x
topology: tpu7x:2x2x1
jax: 0.10.0
libtpu: 0.0.40
codegen_flags: <defaults>
</compile_context>

<pallas_src>
import functools

import jax
import jax.numpy as jnp
from jax import lax
from jax.experimental import pallas as pl
from jax.experimental.pallas import tpu as pltpu


def _band_weights(w_oihw, scale, W, lb):
    """Banded matmul weights for a 3x3 'same' conv, width folded on lanes,
    BN scale folded per output channel, block-diagonal over `lb` batch
    elements folded onto the lane axis.

    w_oihw : (Cout, Cin, 3, 3) PyTorch-layout conv weights (f32).
    scale  : (Cout,) folded BatchNorm scale (f32).
    Returns (3, lb*Cin*W, lb*Cout*W) bf16; one banded matrix per kernel row kh.
    Lane layout is (b, c, w):  lane = b*C*W + c*W + w.
    """
    Cout, Cin, KH, KW = w_oihw.shape
    Lin, Lout = Cin * W, Cout * W

    r = jnp.arange(Lin)
    ci, t = r // W, r % W                       # input channel / width position
    q = jnp.arange(Lout)
    co, w = q // W, q % W                       # output channel / width position

    kw = t[:, None] - w[None, :] + 1            # (Lin, Lout) width tap index
    valid = (kw >= 0) & (kw <= KW - 1)

    wk = jnp.transpose(w_oihw, (2, 1, 0, 3))    # (kh, ci, co, kw)
    band = wk[:, ci[:, None], co[None, :], jnp.clip(kw, 0, KW - 1)]  # (3,Lin,Lout)
    band = jnp.where(valid[None], band, 0.0)
    band = band * scale[co][None, None, :]      # fold BN scale (f32, exact pre-ReLU)

    if lb > 1:                                  # block-diagonal over folded batch
        eye = jnp.eye(lb, dtype=band.dtype)
        band = jnp.einsum('kro,bd->kbrdo', band, eye)
        band = band.reshape(KH, lb * Lin, lb * Lout)
    return band.astype(jnp.bfloat16)


def basic_block_kernel(x_ref, w1_ref, b1_ref, w2_ref, b2_ref, out_ref,
                       xpad_ref, hid_ref, *, H):
    # x_ref   : (H, LIN)        bf16 input, lanes carry (b, c, w)
    # w*_ref  : (3, LIN, LOUT)  bf16 banded conv weights (BN scale folded)
    # b*_ref  : (1, LOUT)       f32 folded BatchNorm shift
    # out_ref : (H, LOUT)       f32 output (lane-dense store)
    # xpad_ref/hid_ref : (HP, L) bf16 VMEM scratch, HP = round_up(H+2, 8)

    # Re-zero the scratch every step: border rows (0 and H+1) must be zero and
    # each core owns its own scratch, so this is megacore-safe; full-width
    # stores, a few KiB total.
    xpad_ref[...] = jnp.zeros_like(xpad_ref)
    hid_ref[...] = jnp.zeros_like(hid_ref)

    # Stage the unpadded input into the height-padded scratch (rows 1..H).
    xpad_ref[1:H + 1, :] = x_ref[...]

    # ---- conv1 (+ folded bn1 scale): 3 full-lane MXU matmuls, then bias+ReLU --
    acc1 = None
    for kh in range(3):                                   # static unroll
        tap = jnp.dot(xpad_ref[kh:kh + H, :], w1_ref[kh],
                      preferred_element_type=jnp.float32)
        acc1 = tap if acc1 is None else acc1 + tap
    y1 = jnp.maximum(acc1 + b1_ref[...], 0.0)              # (H, LOUT) f32

    # Stage the hidden activation (bf16) into its height-padded scratch.
    hid_ref[1:H + 1, :] = y1.astype(hid_ref.dtype)

    # ---- conv2 (+ folded bn2 scale) + bias ------------------------------------
    acc2 = None
    for kh in range(3):
        tap = jnp.dot(hid_ref[kh:kh + H, :], w2_ref[kh],
                      preferred_element_type=jnp.float32)
        acc2 = tap if acc2 is None else acc2 + tap
    y2 = acc2 + b2_ref[...]

    # ---- residual add + ReLU (Cin == Cout, identical lane layout) ------------
    ident = x_ref[...].astype(jnp.float32)
    out_ref[...] = jnp.maximum(y2 + ident, 0.0).astype(out_ref.dtype)


def basic_block_forward(x_nchw, w1_oihw, s1, b1, w2_oihw, s2, b2,
                        *, lane_batch=None):
    """Fused BasicBlock forward. Input/output are NCHW (PyTorch convention)."""
    B, Cin, H, W = x_nchw.shape
    Cout = w1_oihw.shape[0]
    assert Cin == Cout, "downsample=None / stride=1 requires inplanes == planes"

    # How many batch elements to fold onto the lane axis (target 128 lanes).
    if lane_batch is None:
        lane_batch = min(B, max(1, 128 // (W * Cin)))
        while B % lane_batch:
            lane_batch -= 1
    lb = lane_batch
    assert B % lb == 0
    G = B // lb                                   # grid size over batch groups
    LIN = lb * Cin * W
    LOUT = lb * Cout * W
    HP = ((H + 2 + 7) // 8) * 8                   # sublane-aligned padded height

    # (B,C,H,W) -> (G*H, lb*C*W): lanes carry (b, c, w); bf16 for the MXU path.
    x2d = jnp.transpose(x_nchw.reshape(G, lb, Cin, H, W), (0, 3, 1, 2, 4))
    x2d = x2d.reshape(G * H, LIN).astype(jnp.bfloat16)

    band1 = _band_weights(w1_oihw, s1, W, lb)     # (3, LIN, LOUT), bn1 folded
    band2 = _band_weights(w2_oihw, s2, W, lb)     # (3, LOUT, LOUT), bn2 folded
    b1_t = jnp.tile(jnp.repeat(b1, W), lb).reshape(1, LOUT).astype(jnp.float32)
    b2_t = jnp.tile(jnp.repeat(b2, W), lb).reshape(1, LOUT).astype(jnp.float32)

    kernel = functools.partial(basic_block_kernel, H=H)

    out2d = pl.pallas_call(
        kernel,
        out_shape=jax.ShapeDtypeStruct((G * H, LOUT), x_nchw.dtype),
        grid_spec=pltpu.PrefetchScalarGridSpec(
            num_scalar_prefetch=0,
            grid=(G,),
            in_specs=[
                pl.BlockSpec((H, LIN), lambda g: (g, 0)),
                pl.BlockSpec((3, LIN, LOUT), lambda g: (0, 0, 0)),
                pl.BlockSpec((1, LOUT), lambda g: (0, 0)),
                pl.BlockSpec((3, LOUT, LOUT), lambda g: (0, 0, 0)),
                pl.BlockSpec((1, LOUT), lambda g: (0, 0)),
            ],
            out_specs=pl.BlockSpec((H, LOUT), lambda g: (g, 0)),
            scratch_shapes=[pltpu.VMEM((HP, LIN), jnp.bfloat16),
                            pltpu.VMEM((HP, LOUT), jnp.bfloat16)],
        ),
        compiler_params=pltpu.CompilerParams(
            dimension_semantics=("parallel",),
            vmem_limit_bytes=32 * 1024 * 1024,    # safe on v5e/v6e/v7x
        ),
    )(x2d, band1, b1_t, band2, b2_t)

    # (G*H, lb*Cout*W) -> (B, Cout, H, W)
    out = out2d.reshape(G, H, lb, Cout, W)
    out = jnp.transpose(out, (0, 2, 3, 1, 4)).reshape(B, Cout, H, W)
    return out


def init_params(key, inplanes, planes):
    """Deterministic synthetic parameters (PyTorch OIHW conv weights + folded BN)."""
    ks = jax.random.split(key, 10)
    w1 = 0.1 * jax.random.normal(ks[0], (planes, inplanes, 3, 3), jnp.float32)
    w2 = 0.1 * jax.random.normal(ks[1], (planes, planes, 3, 3), jnp.float32)

    def bn(k0, k1, k2, k3):
        gamma = 1.0 + 0.1 * jax.random.normal(k0, (planes,), jnp.float32)
        beta = 0.1 * jax.random.normal(k1, (planes,), jnp.float32)
        mean = 0.1 * jax.random.normal(k2, (planes,), jnp.float32)
        var = jnp.abs(jax.random.normal(k3, (planes,), jnp.float32)) + 0.5
        scale = gamma * lax.rsqrt(var + 1e-5)
        shift = beta - mean * scale
        return scale, shift

    s1, b1 = bn(ks[2], ks[3], ks[4], ks[5])
    s2, b2 = bn(ks[6], ks[7], ks[8], ks[9])
    return w1, s1, b1, w2, s2, b2


def reference_forward(x_nchw, w1_oihw, s1, b1, w2_oihw, s2, b2):
    """Pure-JAX reference (lax conv), matched to the kernel's precision path:
    conv inputs / hidden activation / identity rounded to bf16, BN scales folded
    into the weights before the bf16 cast, f32 accumulation / bias / ReLU.
    This deviates from exact-f32 PyTorch numerics only by bf16 MXU rounding."""
    def rb(t):
        return t.astype(jnp.bfloat16).astype(jnp.float32)

    def conv(a, w):
        return lax.conv_general_dilated(
            a, w, window_strides=(1, 1), padding=((1, 1), (1, 1)),
            dimension_numbers=("NCHW", "OIHW", "NCHW"))

    xb = rb(x_nchw)
    w1f = rb(w1_oihw * s1[:, None, None, None])
    w2f = rb(w2_oihw * s2[:, None, None, None])
    y = jnp.maximum(conv(xb, w1f) + b1[None, :, None, None], 0.0)
    z = conv(rb(y), w2f) + b2[None, :, None, None]
    return jnp.maximum(z + xb, 0.0)


if __name__ == "__main__":
    B, C, H, W = 2, 4, 16, 16          # inplanes = planes = 4, stride = 1
    key = jax.random.PRNGKey(0)
    kx, kp = jax.random.split(key)

    x = jax.random.normal(kx, (B, C, H, W), jnp.float32)   # NCHW, PyTorch-style
    w1, s1, b1, w2, s2, b2 = init_params(kp, C, C)

    out = basic_block_forward(x, w1, s1, b1, w2, s2, b2)
    out = jax.block_until_ready(out)

    ref = jax.block_until_ready(reference_forward(x, w1, s1, b1, w2, s2, b2))
    if not jnp.allclose(out, ref, atol=1e-2, rtol=1e-2):
        err = jnp.max(jnp.abs(out - ref))
        raise AssertionError(
            f"Pallas BasicBlock output mismatch vs JAX reference (max abs err {err})")

    print("KERNEL_OK")
</pallas_src>

<mosaic_0001>
module attributes {stable_mosaic.version = 11 : i64} {
  func.func @basic_block_kernel(%arg0: i32, %arg1: memref<16x128xbf16, #tpu.memory_space<vmem>>, %arg2: memref<3x128x128xbf16, #tpu.memory_space<vmem>>, %arg3: memref<1x128xf32, #tpu.memory_space<vmem>>, %arg4: memref<3x128x128xbf16, #tpu.memory_space<vmem>>, %arg5: memref<1x128xf32, #tpu.memory_space<vmem>>, %arg6: memref<16x128xf32, #tpu.memory_space<vmem>>, %arg7: memref<24x128xbf16, #tpu.memory_space<vmem>>, %arg8: memref<24x128xbf16, #tpu.memory_space<vmem>>) attributes {dimension_semantics = [#tpu.dimension_semantics<parallel>], iteration_bounds = array<i64: 1>, scalar_prefetch = 0 : i64, scratch_operands = 2 : i64, tpu.core_type = #tpu.core_type<tc>, window_params = [{transform_indices = @transform_0, window_bounds = array<i64: 16, 128>}, {pipeline_mode = #tpu.pipeline_mode<synchronous>, transform_indices = @transform_1, window_bounds = array<i64: 3, 128, 128>}, {pipeline_mode = #tpu.pipeline_mode<synchronous>, transform_indices = @transform_2, window_bounds = array<i64: 1, 128>}, {pipeline_mode = #tpu.pipeline_mode<synchronous>, transform_indices = @transform_3, window_bounds = array<i64: 3, 128, 128>}, {pipeline_mode = #tpu.pipeline_mode<synchronous>, transform_indices = @transform_4, window_bounds = array<i64: 1, 128>}, {transform_indices = @transform_5, window_bounds = array<i64: 16, 128>}]} {
    %cst = arith.constant 0.000000e+00 : bf16
    %0 = vector.broadcast %cst : bf16 to vector<24x128xbf16>
    %c0 = arith.constant 0 : index
    %c0_0 = arith.constant 0 : index
    %1 = vector.load %arg7[%c0, %c0_0] : memref<24x128xbf16, #tpu.memory_space<vmem>>, vector<24x128xbf16>
    tpu.vector_store %arg7[%c0, %c0_0], %0 {strides = array<i32>} : memref<24x128xbf16, #tpu.memory_space<vmem>>, vector<24x128xbf16>,
    %cst_1 = arith.constant 0.000000e+00 : bf16
    %2 = vector.broadcast %cst_1 : bf16 to vector<24x128xbf16>
    %c0_2 = arith.constant 0 : index
    %c0_3 = arith.constant 0 : index
    %3 = vector.load %arg8[%c0_2, %c0_3] : memref<24x128xbf16, #tpu.memory_space<vmem>>, vector<24x128xbf16>
    tpu.vector_store %arg8[%c0_2, %c0_3], %2 {strides = array<i32>} : memref<24x128xbf16, #tpu.memory_space<vmem>>, vector<24x128xbf16>,
    %c0_4 = arith.constant 0 : index
    %c0_5 = arith.constant 0 : index
    %4 = vector.load %arg1[%c0_4, %c0_5] : memref<16x128xbf16, #tpu.memory_space<vmem>>, vector<16x128xbf16>
    %c1 = arith.constant 1 : index
    %c0_6 = arith.constant 0 : index
    %5 = vector.load %arg7[%c1, %c0_6] : memref<24x128xbf16, #tpu.memory_space<vmem>>, vector<16x128xbf16>
    tpu.vector_store %arg7[%c1, %c0_6], %4 {strides = array<i32>} : memref<24x128xbf16, #tpu.memory_space<vmem>>, vector<16x128xbf16>,
    %c0_7 = arith.constant 0 : index
    %c0_8 = arith.constant 0 : index
    %6 = vector.load %arg7[%c0_7, %c0_8] : memref<24x128xbf16, #tpu.memory_space<vmem>>, vector<16x128xbf16>
    %c0_9 = arith.constant 0 : index
    %c0_10 = arith.constant 0 : index
    %c0_11 = arith.constant 0 : index
    %7 = vector.load %arg2[%c0_9, %c0_10, %c0_11] : memref<3x128x128xbf16, #tpu.memory_space<vmem>>, vector<1x128x128xbf16>
    %8 = vector.shape_cast %7 : vector<1x128x128xbf16> to vector<128x128xbf16>
    %cst_12 = arith.constant dense<0.000000e+00> : vector<16x128xf32>
    %9 = tpu.matmul %6, %8, %cst_12 {dimension_numbers = #tpu.dot_dimension_numbers<[1], [0], [0], [1], [0, 0, 1, 1], [], []>} : vector<16x128xbf16>, vector<128x128xbf16>, vector<16x128xf32> -> vector<16x128xf32>
    %c1_13 = arith.constant 1 : index
    %c0_14 = arith.constant 0 : index
    %10 = vector.load %arg7[%c1_13, %c0_14] : memref<24x128xbf16, #tpu.memory_space<vmem>>, vector<16x128xbf16>
    %c1_15 = arith.constant 1 : index
    %c0_16 = arith.constant 0 : index
    %c0_17 = arith.constant 0 : index
    %11 = vector.load %arg2[%c1_15, %c0_16, %c0_17] : memref<3x128x128xbf16, #tpu.memory_space<vmem>>, vector<1x128x128xbf16>
    %12 = vector.shape_cast %11 : vector<1x128x128xbf16> to vector<128x128xbf16>
    %cst_18 = arith.constant dense<0.000000e+00> : vector<16x128xf32>
    %13 = tpu.matmul %10, %12, %cst_18 {dimension_numbers = #tpu.dot_dimension_numbers<[1], [0], [0], [1], [0, 0, 1, 1], [], []>} : vector<16x128xbf16>, vector<128x128xbf16>, vector<16x128xf32> -> vector<16x128xf32>
    %14 = arith.addf %9, %13 : vector<16x128xf32>
    %c2 = arith.constant 2 : index
    %c0_19 = arith.constant 0 : index
    %15 = vector.load %arg7[%c2, %c0_19] : memref<24x128xbf16, #tpu.memory_space<vmem>>, vector<16x128xbf16>
    %c2_20 = arith.constant 2 : index
    %c0_21 = arith.constant 0 : index
    %c0_22 = arith.constant 0 : index
    %16 = vector.load %arg2[%c2_20, %c0_21, %c0_22] : memref<3x128x128xbf16, #tpu.memory_space<vmem>>, vector<1x128x128xbf16>
    %17 = vector.shape_cast %16 : vector<1x128x128xbf16> to vector<128x128xbf16>
    %cst_23 = arith.constant dense<0.000000e+00> : vector<16x128xf32>
    %18 = tpu.matmul %15, %17, %cst_23 {dimension_numbers = #tpu.dot_dimension_numbers<[1], [0], [0], [1], [0, 0, 1, 1], [], []>} : vector<16x128xbf16>, vector<128x128xbf16>, vector<16x128xf32> -> vector<16x128xf32>
    %19 = arith.addf %14, %18 : vector<16x128xf32>
    %c0_24 = arith.constant 0 : index
    %c0_25 = arith.constant 0 : index
    %20 = vector.load %arg3[%c0_24, %c0_25] : memref<1x128xf32, #tpu.memory_space<vmem>>, vector<1x128xf32>
    %21 = vector.broadcast %20 : vector<1x128xf32> to vector<16x128xf32>
    %22 = arith.addf %19, %21 : vector<16x128xf32>
    %cst_26 = arith.constant 0.000000e+00 : f32
    %23 = vector.broadcast %cst_26 : f32 to vector<16x128xf32>
    %24 = arith.maximumf %22, %23 : vector<16x128xf32>
    %25 = arith.truncf %24 : vector<16x128xf32> to vector<16x128xbf16>
    %c1_27 = arith.constant 1 : index
    %c0_28 = arith.constant 0 : index
    %26 = vector.load %arg8[%c1_27, %c0_28] : memref<24x128xbf16, #tpu.memory_space<vmem>>, vector<16x128xbf16>
    tpu.vector_store %arg8[%c1_27, %c0_28], %25 {strides = array<i32>} : memref<24x128xbf16, #tpu.memory_space<vmem>>, vector<16x128xbf16>,
    %c0_29 = arith.constant 0 : index
    %c0_30 = arith.constant 0 : index
    %27 = vector.load %arg8[%c0_29, %c0_30] : memref<24x128xbf16, #tpu.memory_space<vmem>>, vector<16x128xbf16>
    %c0_31 = arith.constant 0 : index
    %c0_32 = arith.constant 0 : index
    %c0_33 = arith.constant 0 : index
    %28 = vector.load %arg4[%c0_31, %c0_32, %c0_33] : memref<3x128x128xbf16, #tpu.memory_space<vmem>>, vector<1x128x128xbf16>
    %29 = vector.shape_cast %28 : vector<1x128x128xbf16> to vector<128x128xbf16>
    %cst_34 = arith.constant dense<0.000000e+00> : vector<16x128xf32>
    %30 = tpu.matmul %27, %29, %cst_34 {dimension_numbers = #tpu.dot_dimension_numbers<[1], [0], [0], [1], [0, 0, 1, 1], [], []>} : vector<16x128xbf16>, vector<128x128xbf16>, vector<16x128xf32> -> vector<16x128xf32>
    %c1_35 = arith.constant 1 : index
    %c0_36 = arith.constant 0 : index
    %31 = vector.load %arg8[%c1_35, %c0_36] : memref<24x128xbf16, #tpu.memory_space<vmem>>, vector<16x128xbf16>
    %c1_37 = arith.constant 1 : index
    %c0_38 = arith.constant 0 : index
    %c0_39 = arith.constant 0 : index
    %32 = vector.load %arg4[%c1_37, %c0_38, %c0_39] : memref<3x128x128xbf16, #tpu.memory_space<vmem>>, vector<1x128x128xbf16>
    %33 = vector.shape_cast %32 : vector<1x128x128xbf16> to vector<128x128xbf16>
    %cst_40 = arith.constant dense<0.000000e+00> : vector<16x128xf32>
    %34 = tpu.matmul %31, %33, %cst_40 {dimension_numbers = #tpu.dot_dimension_numbers<[1], [0], [0], [1], [0, 0, 1, 1], [], []>} : vector<16x128xbf16>, vector<128x128xbf16>, vector<16x128xf32> -> vector<16x128xf32>
    %35 = arith.addf %30, %34 : vector<16x128xf32>
    %c2_41 = arith.constant 2 : index
    %c0_42 = arith.constant 0 : index
    %36 = vector.load %arg8[%c2_41, %c0_42] : memref<24x128xbf16, #tpu.memory_space<vmem>>, vector<16x128xbf16>
    %c2_43 = arith.constant 2 : index
    %c0_44 = arith.constant 0 : index
    %c0_45 = arith.constant 0 : index
    %37 = vector.load %arg4[%c2_43, %c0_44, %c0_45] : memref<3x128x128xbf16, #tpu.memory_space<vmem>>, vector<1x128x128xbf16>
    %38 = vector.shape_cast %37 : vector<1x128x128xbf16> to vector<128x128xbf16>
    %cst_46 = arith.constant dense<0.000000e+00> : vector<16x128xf32>
    %39 = tpu.matmul %36, %38, %cst_46 {dimension_numbers = #tpu.dot_dimension_numbers<[1], [0], [0], [1], [0, 0, 1, 1], [], []>} : vector<16x128xbf16>, vector<128x128xbf16>, vector<16x128xf32> -> vector<16x128xf32>
    %40 = arith.addf %35, %39 : vector<16x128xf32>
    %c0_47 = arith.constant 0 : index
    %c0_48 = arith.constant 0 : index
    %41 = vector.load %arg5[%c0_47, %c0_48] : memref<1x128xf32, #tpu.memory_space<vmem>>, vector<1x128xf32>
    %42 = vector.broadcast %41 : vector<1x128xf32> to vector<16x128xf32>
    %43 = arith.addf %40, %42 : vector<16x128xf32>
    %c0_49 = arith.constant 0 : index
    %c0_50 = arith.constant 0 : index
    %44 = vector.load %arg1[%c0_49, %c0_50] : memref<16x128xbf16, #tpu.memory_space<vmem>>, vector<16x128xbf16>
    %45 = arith.extf %44 : vector<16x128xbf16> to vector<16x128xf32>
    %46 = arith.addf %43, %45 : vector<16x128xf32>
    %cst_51 = arith.constant 0.000000e+00 : f32
    %47 = vector.broadcast %cst_51 : f32 to vector<16x128xf32>
    %48 = arith.maximumf %46, %47 : vector<16x128xf32>
    %c0_52 = arith.constant 0 : index
    %c0_53 = arith.constant 0 : index
    %49 = vector.load %arg6[%c0_52, %c0_53] : memref<16x128xf32, #tpu.memory_space<vmem>>, vector<16x128xf32>
    tpu.vector_store %arg6[%c0_52, %c0_53], %48 {strides = array<i32>} : memref<16x128xf32, #tpu.memory_space<vmem>>, vector<16x128xf32>,
    return
  }
  func.func @transform_0(%arg0: i32) -> (i32, i32) {
    %c0_i32 = arith.constant 0 : i32
    %c0_i32_0 = arith.constant 0 : i32
    return %arg0, %c0_i32 : i32, i32
  }
  func.func @transform_1(%arg0: i32) -> (i32, i32, i32) {
    %c0_i32 = arith.constant 0 : i32
    %c0_i32_0 = arith.constant 0 : i32
    %c0_i32_1 = arith.constant 0 : i32
    %c0_i32_2 = arith.constant 0 : i32
    return %c0_i32, %c0_i32_0, %c0_i32_1 : i32, i32, i32
  }
  func.func @transform_2(%arg0: i32) -> (i32, i32) {
    %c0_i32 = arith.constant 0 : i32
    %c0_i32_0 = arith.constant 0 : i32
    %c0_i32_1 = arith.constant 0 : i32
    return %c0_i32, %c0_i32_0 : i32, i32
  }
  func.func @transform_3(%arg0: i32) -> (i32, i32, i32) {
    %c0_i32 = arith.constant 0 : i32
    %c0_i32_0 = arith.constant 0 : i32
    %c0_i32_1 = arith.constant 0 : i32
    %c0_i32_2 = arith.constant 0 : i32
    return %c0_i32, %c0_i32_0, %c0_i32_1 : i32, i32, i32
  }
  func.func @transform_4(%arg0: i32) -> (i32, i32) {
    %c0_i32 = arith.constant 0 : i32
    %c0_i32_0 = arith.constant 0 : i32
    %c0_i32_1 = arith.constant 0 : i32
    return %c0_i32, %c0_i32_0 : i32, i32
  }
  func.func @transform_5(%arg0: i32) -> (i32, i32) {
    %c0_i32 = arith.constant 0 : i32
    %c0_i32_0 = arith.constant 0 : i32
    return %arg0, %c0_i32 : i32, i32
  }
}

</mosaic_0001>

<bundles_post_ra>
// kernel: tpu_custom_call.1
= control target key start
LH: loop header
LB: loop body
LE: loop exit
PB: predicated region body
PF: predicated region fallthrough
CT: control target
= control target key end

     0   :  { %10 = vsyncpa [#allocation5], 0  ;;  %s1511_s0 = inlined_call_operand.hbm [shape: bf16[16,128], index: 0, kind: input, shape index: {}]   ;;  %s1512_s1 = inlined_call_operand.hbm [shape: bf16[3,128,128], index: 1, kind: input, shape index: {}]   ;;  %s1513_s2 = inlined_call_operand.vmem [shape: f32[1,128], index: 2, kind: input, shape index: {}]   ;;  %s1514_s3 = inlined_call_operand.hbm [shape: bf16[3,128,128], index: 3, kind: input, shape index: {}]   ;;  %s1515_s4 = inlined_call_operand.vmem [shape: f32[1,128], index: 4, kind: input, shape index: {}]   ;;  %s1516_s5 = inlined_call_operand.hbm [shape: f32[16,128], index: 5, kind: output, shape index: {}]  }
   0x1   :  { %11 = vsyncpa [#allocation8], 0 }
   0x2   :  { %12 = vsyncpa [#allocation6], 0  ;;  %s1308_s18 = smov [#allocation7]   ;;  %s1309_s20 = smov [#allocation4]  }
   0x3   :  { %s30_s19 = sshll.u32 %s1308_s18, 4  ;;  %s18_s21 = sshll.u32 %s1309_s20, 4  ;;  %s31_s19 = int_to_ptr.vmem [resolvable:$true] %s30_s19  ;;  %s1349_s21 = int_to_ptr.vmem [resolvable:$true] %s18_s21 }
   0x4   :  { %s1214_s24 = scalar_lea.hbm %s1512_s1, 3072 }
   0x5   :  { %p1215_p0 = scmp.ne.s32.totalorder %s1512_s1, %s1214_s24  ;;  %p1218_p1 = scmp.lt.u32.totalorder %s1214_s24, %s1512_s1 }
   0x7   :  { %p1220_p2 = pnand %p1218_p1, %p1215_p0 }
   0x9   :  { %1223 = shalt.err (!%p1220_p2)
}
   0xa   :  { %s1224_s29 = scalar_lea.vmem %s31_s19, 3072  ;;  %p1229_p4 = scmp.lt.s32.totalorder %s31_s19, %s31_s19 }
   0xb   :  { %p1225_p3 = scmp.ne.s32.totalorder %s31_s19, %s1224_s29  ;;  %p1230_p5 = scmp.lt.s32.totalorder %s1224_s29, %s1224_s29 }
   0xd   :  { %p1231_p6 = por %p1230_p5, %p1229_p4 }
   0xf   :  { %p1232_p7 = pnand %p1231_p6, %p1225_p3 }
  0x11   :  { %1235 = shalt.err (!%p1232_p7)
}
  0x12   :  { %s1310_s30 = smov 64   ;;  %s1311_s6 = smov 4  }
  0x13   :  { %36 = dma.hbm_to_vmem [thread:$0]  %s1512_s1, 3072, %s31_s19, [#allocation8], %s1310_s30, %s1310_s30, %s1311_s6  }
  0x14   :  { %s1236_s11 = scalar_lea.hbm %s1511_s0, 128 }
  0x15   :  { %p1237_p8 = scmp.ne.s32.totalorder %s1511_s0, %s1236_s11  ;;  %p1240_p9 = scmp.lt.u32.totalorder %s1236_s11, %s1511_s0 }
  0x17   :  { %p1242_p10 = pnand %p1240_p9, %p1237_p8 }
  0x19   :  { %1245 = shalt.err (!%p1242_p10)
}
  0x1a   :  { %s1246_s16 = scalar_lea.vmem %s1349_s21, 128  ;;  %p1251_p12 = scmp.lt.s32.totalorder %s1349_s21, %s1349_s21 }
  0x1b   :  { %p1247_p11 = scmp.ne.s32.totalorder %s1349_s21, %s1246_s16  ;;  %p1252_p13 = scmp.lt.s32.totalorder %s1246_s16, %s1246_s16 }
  0x1d   :  { %p1253_p0 = por %p1252_p13, %p1251_p12 }
  0x1f   :  { %p1254_p1 = pnand %p1253_p0, %p1247_p11 }
  0x21   :  { %1257 = shalt.err (!%p1254_p1)
}
  0x22   :  { %24 = dma.hbm_to_vmem [thread:$0]  %s1511_s0, 128, %s1349_s21, [#allocation5], %s1310_s30, %s1310_s30, %s1311_s6  }
  0x23   :  { %s1312_s18 = smov [#allocation9]   ;;  %s1258_s23 = scalar_lea.hbm %s1514_s3, 3072 }
  0x24   :  { %s44_s19 = sshll.u32 %s1312_s18, 4  ;;  %p1259_p2 = scmp.ne.s32.totalorder %s1514_s3, %s1258_s23  ;;  %s45_s19 = int_to_ptr.vmem [resolvable:$true] %s44_s19 }
  0x25   :  { %p1262_p3 = scmp.lt.u32.totalorder %s1258_s23, %s1514_s3 }
  0x27   :  { %p1264_p4 = pnand %p1262_p3, %p1259_p2 }
  0x29   :  { %1267 = shalt.err (!%p1264_p4)
}
  0x2a   :  { %s1268_s28 = scalar_lea.vmem %s45_s19, 3072  ;;  %p1273_p6 = scmp.lt.s32.totalorder %s45_s19, %s45_s19 }
  0x2b   :  { %p1269_p5 = scmp.ne.s32.totalorder %s45_s19, %s1268_s28  ;;  %p1274_p7 = scmp.lt.s32.totalorder %s1268_s28, %s1268_s28 }
  0x2d   :  { %p1275_p8 = por %p1274_p7, %p1273_p6 }
  0x2f   :  { %p1276_p9 = pnand %p1275_p8, %p1269_p5 }
  0x31   :  { %1279 = shalt.err (!%p1276_p9)
}
  0x32   :  { %50 = dma.hbm_to_vmem [thread:$0]  %s1514_s3, 3072, %s45_s19, [#allocation8], %s1310_s30, %s1310_s30, %s1311_s6  }
  0x33   :  { %1302 = dma.done.wait [#allocation5], 128  }
  0x34   :  { %1303 = vsyncadd [#allocation5], 4294967168 }
  0x35   :  { %1304 = dma.done.wait [#allocation8], 6144  }
  0x36   :  { %1305 = vsyncadd [#allocation8], 4294961152  ;;  %v1313_v0 = vmov 0.0   ;;  %v1314_v1 = vmov 0   ;;  %vm1315_vm0 = vmmov 0   ;;  %v1158_v2 = vld [vmem:[#allocation7 + $0x40] sm:$0xff]  }
  0x37   :  { %1027 = vmatprep.subr.bf16.mxu0 %v1313_v0  ;;  %1047 = vmatprep.subr.bf16.mxu1 %v1313_v0  ;;  %63 = vst [vmem:[#allocation2] sm:$0xf] %v1314_v1  ;;  %64 = vst [vmem:[#allocation2 + $0x4] sm:$0xf] %v1314_v1  ;;  %v1159_v3 = vld [vmem:[#allocation7] sm:$0xff]   ;;  %v1160_v4 = vld [vmem:[#allocation7 + $0x48] sm:$0xff]  }
  0x38   :  { %65 = vst [vmem:[#allocation2 + $0x8] sm:$0xf] %v1314_v1  ;;  %66 = vst [vmem:[#allocation3] sm:$0xf] %v1314_v1  ;;  %1043 = vmatprep.mubr.msk.bf16.mxu0 %vm1315_vm0, %v1313_v0  ;;  %1063 = vmatprep.mubr.msk.bf16.mxu1 %vm1315_vm0, %v1313_v0  ;;  %v1161_v5 = vld [vmem:[#allocation7 + $0x8] sm:$0xff]   ;;  %v1162_v6 = vld [vmem:[#allocation7 + $0x50] sm:$0xff]  }
  0x39   :  { %67 = vst [vmem:[#allocation3 + $0x4] sm:$0xf] %v1314_v1  ;;  %68 = vst [vmem:[#allocation3 + $0x8] sm:$0xf] %v1314_v1  ;;  %1028 = vmatpush3.bf16.msra.mxu0 %v1158_v2  ;;  %1048 = vmatpush3.bf16.msra.mxu1 %v1159_v3  ;;  %v1163_v7 = vld [vmem:[#allocation7 + $0x10] sm:$0xff]   ;;  %v1164_v8 = vld [vmem:[#allocation7 + $0x58] sm:$0xff]  }
  0x3a   :  { %1029 = vmatprep.subr.bf16.mxu0 %v1313_v0  ;;  %1049 = vmatprep.subr.bf16.mxu1 %v1313_v0  ;;  %vm71_vm1 = vsmask.f32 256  ;;  %v1165_v9 = vld [vmem:[#allocation7 + $0x18] sm:$0xff]   ;;  %vm72_vm2 = vsmask.f32 4368  ;;  %v1166_v10 = vld [vmem:[#allocation7 + $0x60] sm:$0xff]  }
  0x3b   :  { %vm95_vm3 = vsmask.f32 7938  ;;  %vm94_vm4 = vcmask 1043456   ;;  %v1167_v11 = vld [vmem:[#allocation7 + $0x20] sm:$0xff]   ;;  %v69_v12 = vld [vmem:[#allocation4] sm:$0xf]  ;;  %vm1416_vm5 = vmor %vm71_vm1, %vm72_vm2 }
  0x3c   :  { %v70_v13 = vld [vmem:[#allocation4 + $0x4] sm:$0xf]  ;;  %vm101_vm6 = vcmask 1040384   ;;  %v1168_v15 = vld [vmem:[#allocation7 + $0x68] sm:$0xff]   ;;  %v75_v17 = vshrl.u32 %v69_v12, 16  ;;  %v78_v18 = vshll.u32 %v69_v12, 16  ;;  %vm1422_vm7 = vmand %vm94_vm4, %vm95_vm3 }
  0x3d   :  { %1030 = vmatpush3.bf16.msra.mxu0 %v1160_v4  ;;  %1050 = vmatpush3.bf16.msra.mxu1 %v1161_v5  ;;  %v1169_v16 = vld [vmem:[#allocation7 + $0x28] sm:$0xff]   ;;  %v83_v19 = vshrl.u32 %v70_v13, 16  ;;  %v86_v20 = vshll.u32 %v70_v13, 16  ;;  %vm1428_vm8 = vmand %vm101_vm6, %vm71_vm1  ;;  %v1170_v27 = vld [vmem:[#allocation7 + $0x70] sm:$0xff]   ;;  %vm152_vm9 = vsmask.f32 7424 }
  0x3e   :  { %1031 = vmatprep.subr.bf16.mxu0 %v1313_v0  ;;  %1051 = vmatprep.subr.bf16.mxu1 %v1313_v0  ;;  %v97_v22 = vld [vmem:[#allocation2] sm:$0xf]  ;;  %v77_v23 = vrot.slane %v75_v17, 7  ;;  %v1171_v32 = vld [vmem:[#allocation7 + $0x30] sm:$0xff]   ;;  %v1172_v36 = vld [vmem:[#allocation7 + $0x78] sm:$0xff]   ;;  %vm371_vm10 = vcmask 1046528  }
  0x3f   :  { %v85_v24 = vrot.slane %v83_v19, 7  ;;  %v103_v26 = vld [vmem:[#allocation2 + $0x8] sm:$0x1]  ;;  %v1173_v37 = vld [vmem:[#allocation7 + $0x38] sm:$0xff]   ;;  %v1177_v48 = vld [vmem:[#allocation7 + $0x80] sm:$0xff]   ;;  %s1316_s6 = smov [#allocation10]  }
  0x40   :  { %v80_v28 = vor.u32 %v78_v18, %v77_v23  ;;  %v81_v29 = vrot.slane %v77_v23, 4  ;;  %v1178_v51 = vld [vmem:[#allocation7 + $0x88] sm:$0xff]   ;;  %v1179_v52 = vld [vmem:[#allocation7 + $0x90] sm:$0xff]   ;;  %v1180_v53 = vld [vmem:[#allocation7 + $0x98] sm:$0xff]   ;;  %s894_s7 = sshll.u32 %s1316_s6, 4  ;;  %s895_s7 = int_to_ptr.vmem [resolvable:$true] %s894_s7 }
  0x41   :  { %1032 = vmatpush3.bf16.msra.mxu0 %v1162_v6  ;;  %1052 = vmatpush3.bf16.msra.mxu1 %v1163_v7  ;;  %v88_v30 = vor.u32 %v86_v20, %v85_v24  ;;  %v90_v31 = vrot.slane %v85_v24, 4  ;;  %v1181_v54 = vld [vmem:[#allocation7 + $0xa0] sm:$0xff]   ;;  %v1182_v55 = vld [vmem:[#allocation7 + $0xa8] sm:$0xff]   ;;  %v1183_v57 = vld [vmem:[#allocation7 + $0xb0] sm:$0xff]   ;;  %s1280_s8 = scalar_lea.vmem %s895_s7, 256  ;;  %p1285_p11 = scmp.lt.s32.totalorder %s895_s7, %s895_s7 }
  0x42   :  { %1033 = vmatprep.subr.bf16.mxu0 %v1313_v0  ;;  %1053 = vmatprep.subr.bf16.mxu1 %v1313_v0  ;;  %v98_v34 = vsel %vm1422_vm7, %v80_v28, %v97_v22  ;;  %v1184_v59 = vld [vmem:[#allocation7 + $0xb8] sm:$0xff]   ;;  %v1186_v63 = vld [vmem:[#allocation9] sm:$0xff]   ;;  %v1187_v1 = vld [vmem:[#allocation9 + $0x8] sm:$0xff]   ;;  %p1281_p10 = scmp.ne.s32.totalorder %s895_s7, %s1280_s8  ;;  %p1286_p12 = scmp.lt.s32.totalorder %s1280_s8, %s1280_s8 }
  0x43   :  { %v89_v33 = vsel %vm1416_vm5, %v81_v29, %v88_v30  ;;  %v104_v35 = vsel %vm1428_vm8, %v90_v31, %v103_v26  ;;  %99 = vst [vmem:[#allocation2] sm:$0xf] %v98_v34  ;;  %v1188_v2 = vld [vmem:[#allocation9 + $0x40] sm:$0xff]   ;;  %v1189_v3 = vld [vmem:[#allocation9 + $0x10] sm:$0xff]   ;;  %v1190_v4 = vld [vmem:[#allocation9 + $0x48] sm:$0xff]  }
  0x44   :  { %100 = vst [vmem:[#allocation2 + $0x4] sm:$0xf] %v89_v33  ;;  %105 = vst [vmem:[#allocation2 + $0x8] sm:$0x1] %v104_v35  ;;  %v1191_v5 = vld [vmem:[#allocation9 + $0x18] sm:$0xff]   ;;  %v1192_v6 = vld [vmem:[#allocation9 + $0x50] sm:$0xff]   ;;  %p1287_p13 = por %p1286_p12, %p1285_p11 }
  0x45   :  { %1034 = vmatpush3.bf16.msra.mxu0 %v1164_v8  ;;  %1054 = vmatpush3.bf16.msra.mxu1 %v1165_v9  ;;  %v1193_v7 = vld [vmem:[#allocation9 + $0x20] sm:$0xff]   ;;  %v1194_v8 = vld [vmem:[#allocation9 + $0x58] sm:$0xff]   ;;  %v1195_v9 = vld [vmem:[#allocation9 + $0x28] sm:$0xff]  }
  0x46   :  { %1035 = vmatprep.subr.bf16.mxu0 %v1313_v0  ;;  %1055 = vmatprep.subr.bf16.mxu1 %v1313_v0  ;;  %v1198_v12 = vld [vmem:[#allocation9 + $0x68] sm:$0xff]   ;;  %v1199_v13 = vld [vmem:[#allocation9 + $0x38] sm:$0xff]   ;;  %v935_v30 = vld [vmem:[%s1513_s2] ss:$0 sm:$0xff]  ;;  %p1288_p0 = pnand %p1287_p13, %p1281_p10 }
  0x47   :  { %v1206_v25 = vld [vmem:[#allocation9 + $0x88] sm:$0xff]  }
  0x49   :  { %1036 = vmatpush3.bf16.msra.mxu0 %v1166_v10  ;;  %1056 = vmatpush3.bf16.msra.mxu1 %v1167_v11  ;;  %v1196_v10 = vld [vmem:[#allocation9 + $0x60] sm:$0xff]   ;;  %v1197_v11 = vld [vmem:[#allocation9 + $0x30] sm:$0xff]  }
  0x4a   :  { %1037 = vmatprep.subr.bf16.mxu0 %v1313_v0  ;;  %1057 = vmatprep.subr.bf16.mxu1 %v1313_v0  ;;  %v124_v38 = vld [vmem:[#allocation2] sm:$0xf] }
  0x4b   :  { %v125_v39 = vld [vmem:[#allocation2 + $0x4] sm:$0xf]  ;;  %v1175_v41 = vld [vmem:[#allocation2 + $0x8] ss:$0 sps:$4 sm:$0x11]  }
  0x4c   :  { %v907_v40 = vcombine.low %v124_v38, %v125_v39  ;;  %v1176_v42 = vld [vmem:[#allocation2] sm:$0xff]   ;;  %v161_v45 = vshll.u32 %v1175_v41, 16  ;;  %v373_v61 = vrot.slane %v1175_v41, 1 }
  0x4d   :  { %1038 = vmatpush3.bf16.msra.mxu0 %v1168_v15  ;;  %1058 = vmatpush3.bf16.msra.mxu1 %v1169_v16  ;;  %v350_v56 = vld [vmem:[#allocation2] sm:$0xe]  ;;  %v1200_v15 = vld [vmem:[#allocation9 + $0x70] sm:$0xff]   ;;  %v1202_v16 = vld [vmem:[#allocation9 + $0x78] sm:$0xff]  }
  0x4e   :  { %1039 = vmatprep.subr.bf16.mxu0 %v1313_v0  ;;  %1059 = vmatprep.subr.bf16.mxu1 %v1313_v0  ;;  %v154_v43 = vshrl.u32 %v907_v40, 16  ;;  %v156_v44 = vshll.u32 %v907_v40, 16  ;;  %v163_v47 = vrot.slane %v161_v45, 1  ;;  %v926_v58 = vcombine.low %v350_v56, %v125_v39 }
  0x50   :  { %v158_v46 = vrot.slane %v156_v44, 1  ;;  %v372_v60 = vrot.slane %v926_v58, 1 }
  0x51   :  { %1040 = vmatpush3.bf16.msra.mxu0 %v1170_v27  ;;  %1060 = vmatpush3.bf16.msra.mxu1 %v1171_v32 }
  0x52   :  { %1041 = vmatprep.subr.bf16.mxu0 %v1313_v0  ;;  %1061 = vmatprep.subr.bf16.mxu1 %v1313_v0  ;;  %v159_v49 = vor.u32 %v158_v46, %v154_v43  ;;  %v374_v62 = vsel %vm371_vm10, %v372_v60, %v373_v61  ;;  %v504_v46 = vld [vmem:[#allocation3] sm:$0xf] }
  0x54   :  { %v164_v50 = vsel %vm152_vm9, %v159_v49, %v163_v47 }
  0x55   :  { %1042 = vmatpush3.bf16.msra.mxu0 %v1172_v36  ;;  %1062 = vmatpush3.bf16.msra.mxu1 %v1173_v37 }
  0x56   :  { %1067 = vmatprep.subr.bf16.mxu0 %v1313_v0  ;;  %1087 = vmatprep.subr.bf16.mxu1 %v1313_v0 }
  0x58   :  { %1064 = vmatmul.mubr.bf16.vlgmr.msra.gmra.mrb[0].mxu1 %v1176_v42  ;;  %1044 = vmatmul.mubr.bf16.vlgmr.msra.gmra.mrb[0].mxu0 %v164_v50  ;;  %v508_v50 = vld [vmem:[#allocation3 + $0x8] sm:$0x1] }
  0x59   :  { %1103 = vmatprep.mubr.msk.bf16.mxu1 %vm1315_vm0, %v1313_v0  ;;  %1068 = vmatpush3.bf16.msra.mxu0 %v1177_v48 }
  0x5a   :  { %1083 = vmatprep.mubr.msk.bf16.mxu0 %vm1315_vm0, %v1313_v0  ;;  %1069 = vmatprep.subr.bf16.mxu0 %v1313_v0 }
  0x5b   :  { %1088 = vmatpush3.bf16.msra.mxu1 %v1188_v2 }
  0x5c   :  { %1089 = vmatprep.subr.bf16.mxu1 %v1313_v0 }
  0x5d   :  { %1070 = vmatpush3.bf16.msra.mxu0 %v1178_v51 }
  0x5e   :  { %1071 = vmatprep.subr.bf16.mxu0 %v1313_v0 }
  0x5f   :  { %1090 = vmatpush3.bf16.msra.mxu1 %v1190_v4  ;;  %v1205_v4 = vld [vmem:[#allocation9 + $0x80] sm:$0xff]  }
  0x60   :  { %1091 = vmatprep.subr.bf16.mxu1 %v1313_v0 }
  0x61   :  { %1072 = vmatpush3.bf16.msra.mxu0 %v1179_v52 }
  0x62   :  { %1073 = vmatprep.subr.bf16.mxu0 %v1313_v0 }
  0x63   :  { %1092 = vmatpush3.bf16.msra.mxu1 %v1192_v6  ;;  %v1208_v6 = vld [vmem:[#allocation9 + $0x98] sm:$0xff]  }
  0x64   :  { %1093 = vmatprep.subr.bf16.mxu1 %v1313_v0 }
  0x65   :  { %1074 = vmatpush3.bf16.msra.mxu0 %v1180_v53 }
  0x66   :  { %1075 = vmatprep.subr.bf16.mxu0 %v1313_v0 }
  0x67   :  { %1094 = vmatpush3.bf16.msra.mxu1 %v1194_v8  ;;  %v1210_v8 = vld [vmem:[#allocation9 + $0xa8] sm:$0xff]  }
  0x68   :  { %1095 = vmatprep.subr.bf16.mxu1 %v1313_v0 }
  0x69   :  { %1076 = vmatpush3.bf16.msra.mxu0 %v1181_v54 }
  0x6a   :  { %1077 = vmatprep.subr.bf16.mxu0 %v1313_v0 }
  0x6b   :  { %1096 = vmatpush3.bf16.msra.mxu1 %v1196_v10 }
  0x6c   :  { %1097 = vmatprep.subr.bf16.mxu1 %v1313_v0 }
  0x6d   :  { %1078 = vmatpush3.bf16.msra.mxu0 %v1182_v55 }
  0x6e   :  { %1079 = vmatprep.subr.bf16.mxu0 %v1313_v0 }
  0x6f   :  { %1098 = vmatpush3.bf16.msra.mxu1 %v1198_v12  ;;  %v1212_v12 = vld [vmem:[#allocation9 + $0xb8] sm:$0xff]  }
  0x70   :  { %1099 = vmatprep.subr.bf16.mxu1 %v1313_v0 }
  0x71   :  { %1080 = vmatpush3.bf16.msra.mxu0 %v1183_v57 }
  0x72   :  { %1081 = vmatprep.subr.bf16.mxu0 %v1313_v0 }
  0x73   :  { %1100 = vmatpush3.bf16.msra.mxu1 %v1200_v15 }
  0x74   :  { %1101 = vmatprep.subr.bf16.mxu1 %v1313_v0 }
  0x75   :  { %1082 = vmatpush3.bf16.msra.mxu0 %v1184_v59 }
  0x76   :  { %1107 = vmatprep.subr.bf16.mxu0 %v1313_v0 }
  0x77   :  { %1102 = vmatpush3.bf16.msra.mxu1 %v1202_v16 }
  0x78   :  { %1084 = vmatmul.mubr.bf16.vlgmr.msra.gmra.mrb[4].mxu0 %v374_v62  ;;  %1127 = vmatprep.subr.bf16.mxu1 %v1313_v0 }
  0x79   :  { %1123 = vmatprep.mubr.msk.bf16.mxu0 %vm1315_vm0, %v1313_v0  ;;  %1108 = vmatpush3.bf16.msra.mxu0 %v1186_v63 }
  0x7a   :  { %1109 = vmatprep.subr.bf16.mxu0 %v1313_v0 }
  0x7d   :  { %1110 = vmatpush3.bf16.msra.mxu0 %v1187_v1 }
  0x7e   :  { %1111 = vmatprep.subr.bf16.mxu0 %v1313_v0 }
  0x81   :  { %1112 = vmatpush3.bf16.msra.mxu0 %v1189_v3 }
  0x82   :  { %1113 = vmatprep.subr.bf16.mxu0 %v1313_v0 }
  0x85   :  { %1114 = vmatpush3.bf16.msra.mxu0 %v1191_v5  ;;  %v1207_v5 = vld [vmem:[#allocation9 + $0x90] sm:$0xff]  }
  0x86   :  { %1115 = vmatprep.subr.bf16.mxu0 %v1313_v0 }
  0x89   :  { %1116 = vmatpush3.bf16.msra.mxu0 %v1193_v7  ;;  %v1209_v7 = vld [vmem:[#allocation9 + $0xa0] sm:$0xff]  }
  0x8a   :  { %1117 = vmatprep.subr.bf16.mxu0 %v1313_v0 }
  0x8d   :  { %1118 = vmatpush3.bf16.msra.mxu0 %v1195_v9  ;;  %v1211_v9 = vld [vmem:[#allocation9 + $0xb0] sm:$0xff]  }
  0x8e   :  { %1119 = vmatprep.subr.bf16.mxu0 %v1313_v0 }
  0x91   :  { %1120 = vmatpush3.bf16.msra.mxu0 %v1197_v11 }
  0x92   :  { %1121 = vmatprep.subr.bf16.mxu0 %v1313_v0 }
  0x95   :  { %1122 = vmatpush3.bf16.msra.mxu0 %v1199_v13 }
 0x12b   :  { %v343_v17 = vpop.f32.mrb[0].mxu1  ;;  %v248_v22 = vpop.f32.mrb[0].mxu0 }
 0x12c   :  { %v1065_v18 = vpop.f32.mrb[1].mxu1  ;;  %v344_v23 = vadd.f32 %v343_v17, %v248_v22  ;;  %v1045_v24 = vpop.f32.mrb[1].mxu0 }
 0x12d   :  { %v346_v19 = vpop.f32.mrb[2].mxu1  ;;  %v251_v26 = vpop.f32.mrb[2].mxu0 }
 0x12e   :  { %v1066_v20 = vpop.f32.mrb[3].mxu1  ;;  %v347_v27 = vadd.f32 %v346_v19, %v251_v26  ;;  %v1046_v28 = vpop.f32.mrb[3].mxu0 }
 0x14b   :  { %v458_v29 = vpop.f32.mrb[4].mxu0 }
 0x14c   :  { %v465_v31 = vadd.f32 %v458_v29, %v344_v23  ;;  %v1085_v32 = vpop.f32.mrb[5].mxu0  ;;  %v970_v29 = vld [vmem:[#allocation4] sm:$0xff]  }
 0x14d   :  { %v461_v33 = vpop.f32.mrb[6].mxu0  ;;  %v971_v32 = vunpack.c.l.bf16 %v970_v29 }
 0x14e   :  { %v474_v34 = vadd.f32 %v935_v30, %v465_v31  ;;  %v466_v35 = vadd.f32 %v461_v33, %v347_v27  ;;  %v1086_v36 = vpop.f32.mrb[7].mxu0 }
 0x150   :  { %v476_v37 = vmax.f32 %v474_v34, 0.0  ;;  %v475_v38 = vadd.f32 %v935_v30, %v466_v35 }
 0x152   :  { %v967_v39 = vpack.c.bf16 %v476_v37, %v476_v37  ;;  %v477_v40 = vmax.f32 %v475_v38, 0.0  ;;  %v972_v37 = vunpack.c.h.bf16 %v970_v29 }
 0x154   :  { %v485_v41 = vshrl.u32 %v967_v39, 16  ;;  %v968_v42 = vpack.c.bf16 %v477_v40, %v477_v40  ;;  %v488_v44 = vshll.u32 %v967_v39, 16 }
 0x156   :  { %v487_v43 = vrot.slane %v485_v41, 7  ;;  %v493_v45 = vshrl.u32 %v968_v42, 16  ;;  %v496_v49 = vshll.u32 %v968_v42, 16 }
 0x158   :  { %v490_v47 = vor.u32 %v488_v44, %v487_v43  ;;  %v495_v48 = vrot.slane %v493_v45, 7  ;;  %v491_v51 = vrot.slane %v487_v43, 4 }
 0x15a   :  { %v505_v52 = vsel %vm1422_vm7, %v490_v47, %v504_v46  ;;  %v498_v53 = vor.u32 %v496_v49, %v495_v48  ;;  %v500_v54 = vrot.slane %v495_v48, 4 }
 0x15b   :  { %506 = vst [vmem:[#allocation3] sm:$0xf] %v505_v52 }
 0x15c   :  { %v499_v55 = vsel %vm1416_vm5, %v491_v51, %v498_v53  ;;  %v509_v56 = vsel %vm1428_vm8, %v500_v54, %v508_v50 }
 0x15d   :  { %507 = vst [vmem:[#allocation3 + $0x4] sm:$0xf] %v499_v55  ;;  %510 = vst [vmem:[#allocation3 + $0x8] sm:$0x1] %v509_v56 }
 0x162   :  { %v529_v57 = vld [vmem:[#allocation3] sm:$0xf] }
 0x163   :  { %v754_v10 = vld [vmem:[#allocation3] sm:$0xe] }
 0x164   :  { %v1201_v58 = vld [vmem:[#allocation3] sm:$0xff]   ;;  %v1204_v61 = vld [vmem:[#allocation3 + $0x8] ss:$0 sps:$4 sm:$0x11]  }
 0x165   :  { %v530_v59 = vld [vmem:[#allocation3 + $0x4] sm:$0xf]  ;;  %1124 = vmatmul.mubr.bf16.vlgmr.msra.gmra.mrb[8].mxu0 %v1201_v58  ;;  %v565_v21 = vshll.u32 %v1204_v61, 16  ;;  %v776_v15 = vrot.slane %v1204_v61, 1 }
 0x166   :  { %v938_v60 = vcombine.low %v529_v57, %v530_v59  ;;  %v957_v11 = vcombine.low %v754_v10, %v530_v59 }
 0x167   :  { %v567_v3 = vrot.slane %v565_v21, 1 }
 0x168   :  { %v560_v62 = vshll.u32 %v938_v60, 16  ;;  %v558_v63 = vshrl.u32 %v938_v60, 16  ;;  %v775_v13 = vrot.slane %v957_v11, 1 }
 0x16a   :  { %v562_v1 = vrot.slane %v560_v62, 1  ;;  %v777_v16 = vsel %vm371_vm10, %v775_v13, %v776_v15 }
 0x16c   :  { %v563_v2 = vor.u32 %v562_v1, %v558_v63 }
 0x16e   :  { %v568_v14 = vsel %vm152_vm9, %v563_v2, %v567_v3 }
 0x16f   :  { %1104 = vmatmul.mubr.bf16.vlgmr.msra.gmra.mrb[4].mxu1 %v568_v14 }
 0x170   :  { %1128 = vmatpush3.bf16.msra.mxu1 %v1205_v4  ;;  %1143 = vmatprep.mubr.msk.bf16.mxu1 %vm1315_vm0, %v1313_v0 }
 0x171   :  { %1129 = vmatprep.subr.bf16.mxu1 %v1313_v0 }
 0x174   :  { %1130 = vmatpush3.bf16.msra.mxu1 %v1206_v25 }
 0x175   :  { %1131 = vmatprep.subr.bf16.mxu1 %v1313_v0 }
 0x178   :  { %1132 = vmatpush3.bf16.msra.mxu1 %v1207_v5 }
 0x179   :  { %1133 = vmatprep.subr.bf16.mxu1 %v1313_v0 }
 0x17c   :  { %1134 = vmatpush3.bf16.msra.mxu1 %v1208_v6 }
 0x17d   :  { %1135 = vmatprep.subr.bf16.mxu1 %v1313_v0 }
 0x180   :  { %1136 = vmatpush3.bf16.msra.mxu1 %v1209_v7 }
 0x181   :  { %1137 = vmatprep.subr.bf16.mxu1 %v1313_v0 }
 0x184   :  { %1138 = vmatpush3.bf16.msra.mxu1 %v1210_v8 }
 0x185   :  { %1139 = vmatprep.subr.bf16.mxu1 %v1313_v0 }
 0x188   :  { %1140 = vmatpush3.bf16.msra.mxu1 %v1211_v9 }
 0x189   :  { %1141 = vmatprep.subr.bf16.mxu1 %v1313_v0  ;;  %v966_v0 = vld [vmem:[%s1515_s4] ss:$0 sm:$0xff] }
 0x18c   :  { %1142 = vmatpush3.bf16.msra.mxu1 %v1212_v12 }
 0x18f   :  { %1144 = vmatmul.mubr.bf16.vlgmr.msra.gmra.mrb[8].mxu1 %v777_v16 }
 0x238   :  { %v747_v17 = vpop.f32.mrb[8].mxu0 }
 0x239   :  { %v1125_v18 = vpop.f32.mrb[9].mxu0 }
 0x23a   :  { %v750_v19 = vpop.f32.mrb[10].mxu0 }
 0x23b   :  { %v1126_v20 = vpop.f32.mrb[11].mxu0 }
 0x242   :  { %v652_v22 = vpop.f32.mrb[4].mxu1 }
 0x243   :  { %v748_v23 = vadd.f32 %v747_v17, %v652_v22  ;;  %v1105_v24 = vpop.f32.mrb[5].mxu1 }
 0x244   :  { %v655_v26 = vpop.f32.mrb[6].mxu1 }
 0x245   :  { %v751_v27 = vadd.f32 %v750_v19, %v655_v26  ;;  %v1106_v28 = vpop.f32.mrb[7].mxu1 }
 0x262   :  { %v861_v30 = vpop.f32.mrb[8].mxu1 }
 0x263   :  { %v868_v31 = vadd.f32 %v861_v30, %v748_v23  ;;  %v1145_v33 = vpop.f32.mrb[9].mxu1 }
 0x264   :  { %v864_v34 = vpop.f32.mrb[10].mxu1 }
 0x265   :  { %v877_v35 = vadd.f32 %v966_v0, %v868_v31  ;;  %v869_v36 = vadd.f32 %v864_v34, %v751_v27  ;;  %v1146_v38 = vpop.f32.mrb[11].mxu1 }
 0x267   :  { %v883_v39 = vadd.f32 %v971_v32, %v877_v35  ;;  %v878_v40 = vadd.f32 %v966_v0, %v869_v36 }
 0x269   :  { %v885_v41 = vmax.f32 %v883_v39, 0.0  ;;  %v884_v42 = vadd.f32 %v972_v37, %v878_v40 }
 0x26b   :  { %887 = vst [vmem:[#allocation10] sm:$0xff] %v885_v41  ;;  %v886_v43 = vmax.f32 %v884_v42, 0.0 }
 0x26d   :  { %888 = vst [vmem:[#allocation10 + $0x8] sm:$0xff] %v886_v43 }
 0x26e   :  { %1291 = shalt.err (!%p1288_p0)
}
 0x26f   :  { %s1292_s10 = scalar_lea.hbm %s1516_s5, 256 }
 0x270   :  { %p1293_p1 = scmp.ne.s32.totalorder %s1516_s5, %s1292_s10  ;;  %p1296_p2 = scmp.lt.u32.totalorder %s1292_s10, %s1516_s5 }
 0x272   :  { %p1298_p3 = pnand %p1296_p2, %p1293_p1 }
 0x274   :  { %1301 = shalt.err (!%p1298_p3)
}
 0x275   :  { %s1317_s15 = smov 128   ;;  %s1318_s16 = smov 8  }
 0x276   :  { %900 = dma.vmem_to_hbm [thread:$0]  %s895_s7, 256, %s1516_s5, [#allocation6], %s1317_s15, %s1317_s15, %s1318_s16  }
 0x277   :  { %1306 = dma.done.wait [#allocation6], 256  }
 0x278   :  { %1307 = vsyncadd [#allocation6], 4294967040 }
 0x279   :  { %904 = vsyncpa [#allocation5], 1 }
 0x27a   :  { %905 = vsyncpa [#allocation8], 1 }
 0x27b   :  { %906 = vsyncpa [#allocation6], 1 }

</bundles_post_ra>
